<compile_context>
chip_gen: v6e
topology: v6e:2x2x1
jax: 0.10.0
libtpu: 0.0.40
codegen_flags: <defaults>
</compile_context>

<pallas_src>
import functools

import jax
import jax.numpy as jnp
from jax.experimental import pallas as pl
from jax.experimental.pallas import tpu as pltpu


def _xent_kernel(probs_ref, labels_ref, out_ref, *, pad_idx, alpha, n_rows, tile_rows):
    i = pl.program_id(0)

    labels = labels_ref[...]                            # [T, 1] int32
    T = labels.shape[0]
    C = probs_ref.shape[1]

    # Smoothing weight as a select between two constants (no onehot / extra adds):
    #   weight = (1-a) + a/C  on the label lane,  a/C  elsewhere.
    class_ids = jax.lax.broadcasted_iota(jnp.int32, (T, C), 1)
    w_hit = jnp.float32(1.0 - alpha + alpha / C)
    w_miss = jnp.float32(alpha / C)
    weight = jnp.where(class_ids == labels, w_hit, w_miss)               # [T, C] f32

    # Cast in-kernel (VPU); Mosaic fuses the convert with its consumers below.
    probs = probs_ref[...].astype(jnp.float32)                           # [T, C]

    # Exactly two lane reductions per row:
    #   sum(smooth * log_softmax) == sum(probs * weight) - lse   (since sum(weight) == 1)
    wsum = jnp.sum(probs * weight, axis=-1, keepdims=True)               # [T, 1]
    # Reference-faithful log-sum-exp (no max trick; module guarantees probs in [0,1)).
    # TODO(synk): add max-subtraction if real logits (|x| > ~88) ever feed this kernel.
    lse = jnp.log(jnp.sum(jnp.exp(probs), axis=-1, keepdims=True))       # [T, 1]

    scores = wsum - lse                                                  # [T, 1]

    # Mask padded tail rows (last block may extend past N -> stale VMEM is discarded
    # here, before the row-axis sum) and pad-label rows.
    row_ids = i * tile_rows + jax.lax.broadcasted_iota(jnp.int32, (T, 1), 0)
    valid = (row_ids < n_rows) & (labels != pad_idx)
    scores = jnp.where(valid, scores, 0.0)

    # Per-tile partial sum, written lane-dense; host does the final sum/negate/divide.
    psum = jnp.sum(scores, axis=0, keepdims=True)                        # (1, 1)
    out_ref[...] = jnp.broadcast_to(psum, out_ref.shape)                 # (1, 1, 128)


def cross_entropy_loss(probs, labels, pad_idx, alpha=0.1, tile_rows=None):
    """probs: [B, L, C] float (any float dtype), labels: [B, L] int -> scalar f32 loss."""
    B, L, C = probs.shape
    N = B * L
    probs2 = probs.reshape(N, C)                    # native dtype, no host cast / no pad
    labels2 = labels.reshape(N, 1).astype(jnp.int32)

    itemsize = jnp.dtype(probs2.dtype).itemsize

    # Physical VMEM per core: v5e/v6e 128 MiB, v7x 64 MiB.
    try:
        vmem_cap = int(pltpu.get_tpu_info().vmem_capacity_bytes)
    except Exception:
        vmem_cap = 64 * 1024 * 1024                 # conservative fallback (v7x-sized)
    vmem_limit = (vmem_cap * 3) // 4                # scoped limit requested from Mosaic

    if tile_rows is None:
        # Per-row VMEM footprint:
        #   2x double-buffered input tile (lane dim padded to 128 in VMEM)
        # + ~3 [T,C] f32 elementwise temporaries (weight, product, exp)
        # + double-buffered labels.
        c_pad = ((C + 127) // 128) * 128
        bytes_per_row = c_pad * (2 * itemsize + 3 * 4) + 2 * 4
        budget = int(vmem_cap * 0.55)               # headroom below the scoped limit
        tile_rows = budget // bytes_per_row
        # TODO(synk): for very large C (big vocab) chunk the class axis in-kernel so
        # row tiles stay multi-MiB independent of C (only matters on 64 MiB v7x VMEM).

    tile_rows = max(8, int(tile_rows))
    tile_rows = min(tile_rows, ((N + 7) // 8) * 8)  # no point exceeding the problem
    align = 32 if tile_rows >= 32 else 8            # 32-sublane native packing when possible
    tile_rows = max(align, (tile_rows // align) * align)

    num_tiles = -(-N // tile_rows)
    # v7x megacore: with a "parallel" row axis, an odd tile count (>1) strands one TC
    # for up to a full tile; nudge tile_rows so the tile count comes out even.
    if num_tiles > 1 and num_tiles % 2 == 1:
        tr = -(-N // (num_tiles + 1))
        tile_rows = max(align, ((tr + align - 1) // align) * align)
        num_tiles = -(-N // tile_rows)

    kernel = functools.partial(
        _xent_kernel,
        pad_idx=int(pad_idx),
        alpha=float(alpha),
        n_rows=N,
        tile_rows=tile_rows,
    )

    partials = pl.pallas_call(
        kernel,
        out_shape=jax.ShapeDtypeStruct((num_tiles, 1, 128), jnp.float32),
        grid_spec=pltpu.PrefetchScalarGridSpec(
            num_scalar_prefetch=0,
            grid=(num_tiles,),
            in_specs=[
                pl.BlockSpec((tile_rows, C), lambda i: (i, 0)),
                pl.BlockSpec((tile_rows, 1), lambda i: (i, 0)),
            ],
            out_specs=pl.BlockSpec((1, 1, 128), lambda i: (i, 0, 0)),
        ),
        compiler_params=pltpu.CompilerParams(
            # Independent per-tile partials -> parallel axis (2 TensorCores on v7x).
            dimension_semantics=("parallel",),
            vmem_limit_bytes=vmem_limit,
        ),
    )(probs2, labels2)

    # All 128 lanes of each partial hold the same value; take lane 0 of each tile.
    return -jnp.sum(partials[:, 0, 0]) / jnp.float32(B)


def _reference(probs, labels, pad_idx, alpha):
    B, L, C = probs.shape
    ignore = labels == pad_idx
    p = probs.astype(jnp.float32)
    onehot = (jnp.arange(C)[None, None, :] == labels[..., None]).astype(jnp.float32)
    smooth = (1.0 - alpha) * onehot + alpha / C
    log_sm = p - jnp.log(jnp.sum(jnp.exp(p), axis=-1, keepdims=True))
    scores = jnp.sum(smooth * log_sm, axis=-1)
    scores = jnp.where(ignore, 0.0, scores)
    return -jnp.sum(scores) / B


if __name__ == "__main__":
    # Small shapes consistent with the module: batch=2, seq=8, n_classes=32
    B, L, C = 2, 8, 32
    pad_idx = 0
    alpha = 0.1

    key = jax.random.PRNGKey(0)
    k1, k2 = jax.random.split(key)
    probs = jax.random.uniform(k1, (B, L, C), dtype=jnp.float32)      # values in [0, 1)
    labels = jax.random.randint(k2, (B, L), 0, C, dtype=jnp.int32)    # includes some pad_idx

    loss = cross_entropy_loss(probs, labels, pad_idx, alpha)
    loss = jax.block_until_ready(loss)

    ref = _reference(probs, labels, pad_idx, alpha)
    assert jnp.allclose(loss, ref, atol=1e-4, rtol=1e-4), (loss, ref)

    print("KERNEL_OK")
</pallas_src>

<mosaic_0001>
module attributes {stable_mosaic.version = 11 : i64} {
  func.func @_xent_kernel(%arg0: i32, %arg1: memref<16x32xf32, #tpu.memory_space<vmem>>, %arg2: memref<16x1xi32, #tpu.memory_space<vmem>>, %arg3: memref<1x1x128xf32, #tpu.memory_space<vmem>>) attributes {dimension_semantics = [#tpu.dimension_semantics<parallel>], iteration_bounds = array<i64: 1>, scalar_prefetch = 0 : i64, scratch_operands = 0 : i64, tpu.core_type = #tpu.core_type<tc>, window_params = [{transform_indices = @transform_0, window_bounds = array<i64: 16, 32>}, {transform_indices = @transform_1, window_bounds = array<i64: 16, 1>}, {transform_indices = @transform_2, window_bounds = array<i64: 1, 1, 128>}]} {
    %c0 = arith.constant 0 : index
    %c0_0 = arith.constant 0 : index
    %0 = vector.load %arg2[%c0, %c0_0] : memref<16x1xi32, #tpu.memory_space<vmem>>, vector<16x1xi32>
    %1 = tpu.iota {dimensions = array<i32: 1>} : vector<16x32xi32>
    %2 = vector.broadcast %0 : vector<16x1xi32> to vector<16x32xi32>
    %3 = arith.cmpi eq, %1, %2 : vector<16x32xi32>
    %cst = arith.constant 0.903124988 : f32
    %cst_1 = arith.constant 3.125000e-03 : f32
    %4 = vector.broadcast %cst : f32 to vector<16x32xf32>
    %5 = vector.broadcast %cst_1 : f32 to vector<16x32xf32>
    %6 = arith.select %3, %4, %5 : vector<16x32xi1>, vector<16x32xf32>
    %c0_2 = arith.constant 0 : index
    %c0_3 = arith.constant 0 : index
    %7 = vector.load %arg1[%c0_2, %c0_3] : memref<16x32xf32, #tpu.memory_space<vmem>>, vector<16x32xf32>
    %8 = arith.mulf %7, %6 : vector<16x32xf32>
    %cst_4 = arith.constant dense<0.000000e+00> : vector<16xf32>
    %9 = vector.multi_reduction <add>, %8, %cst_4 [1] : vector<16x32xf32> to vector<16xf32>
    %10 = vector.shape_cast %9 : vector<16xf32> to vector<16x1xf32>
    %11 = math.exp %7 : vector<16x32xf32>
    %cst_5 = arith.constant dense<0.000000e+00> : vector<16xf32>
    %12 = vector.multi_reduction <add>, %11, %cst_5 [1] : vector<16x32xf32> to vector<16xf32>
    %13 = vector.shape_cast %12 : vector<16xf32> to vector<16x1xf32>
    %14 = math.log %13 : vector<16x1xf32>
    %15 = arith.subf %10, %14 : vector<16x1xf32>
    %c16_i32 = arith.constant 16 : i32
    %16 = arith.muli %arg0, %c16_i32 : i32
    %17 = tpu.iota {dimensions = array<i32: 0>} : vector<16x1xi32>
    %18 = vector.broadcast %16 : i32 to vector<16x1xi32>
    %19 = arith.addi %18, %17 : vector<16x1xi32>
    %c16_i32_6 = arith.constant 16 : i32
    %20 = vector.broadcast %c16_i32_6 : i32 to vector<16x1xi32>
    %21 = arith.cmpi slt, %19, %20 : vector<16x1xi32>
    %c0_i32 = arith.constant 0 : i32
    %22 = vector.broadcast %c0_i32 : i32 to vector<16x1xi32>
    %23 = arith.cmpi ne, %0, %22 : vector<16x1xi32>
    %24 = arith.andi %21, %23 : vector<16x1xi1>
    %cst_7 = arith.constant 0.000000e+00 : f32
    %25 = vector.broadcast %cst_7 : f32 to vector<16x1xf32>
    %26 = arith.select %24, %15, %25 : vector<16x1xi1>, vector<16x1xf32>
    %cst_8 = arith.constant dense<0.000000e+00> : vector<1xf32>
    %27 = vector.multi_reduction <add>, %26, %cst_8 [0] : vector<16x1xf32> to vector<1xf32>
    %28 = vector.shape_cast %27 : vector<1xf32> to vector<1x1xf32>
    %29 = vector.shape_cast %28 : vector<1x1xf32> to vector<1x1x1xf32>
    %30 = vector.broadcast %29 : vector<1x1x1xf32> to vector<1x1x128xf32>
    %c0_9 = arith.constant 0 : index
    %c0_10 = arith.constant 0 : index
    %c0_11 = arith.constant 0 : index
    %31 = vector.load %arg3[%c0_9, %c0_10, %c0_11] : memref<1x1x128xf32, #tpu.memory_space<vmem>>, vector<1x1x128xf32>
    tpu.vector_store %arg3[%c0_9, %c0_10, %c0_11], %30 {strides = array<i32>} : memref<1x1x128xf32, #tpu.memory_space<vmem>>, vector<1x1x128xf32>,
    return
  }
  func.func @transform_0(%arg0: i32) -> (i32, i32) {
    %c0_i32 = arith.constant 0 : i32
    %c0_i32_0 = arith.constant 0 : i32
    return %arg0, %c0_i32 : i32, i32
  }
  func.func @transform_1(%arg0: i32) -> (i32, i32) {
    %c0_i32 = arith.constant 0 : i32
    %c0_i32_0 = arith.constant 0 : i32
    return %arg0, %c0_i32 : i32, i32
  }
  func.func @transform_2(%arg0: i32) -> (i32, i32, i32) {
    %c0_i32 = arith.constant 0 : i32
    %c0_i32_0 = arith.constant 0 : i32
    %c0_i32_1 = arith.constant 0 : i32
    return %arg0, %c0_i32, %c0_i32_0 : i32, i32, i32
  }
}

</mosaic_0001>

<bundles_post_ra>
// kernel: tpu_custom_call.1
= control target key start
LH: loop header
LB: loop body
LE: loop exit
PB: predicated region body
PF: predicated region fallthrough
CT: control target
= control target key end

     0   :  { %v133_v2 = vmov 0   ;;  %s170_s0 = inlined_call_operand.vmem [shape: f32[16,32], index: 0, kind: input, shape index: {}]   ;;  %s171_s1 = inlined_call_operand.vmem [shape: s32[16,1], index: 1, kind: input, shape index: {}]   ;;  %s172_s2 = inlined_call_operand.hbm [shape: f32[1,1,128], index: 2, kind: output, shape index: {}]  }
   0x1   :  { %v12_v0 = vld [vmem:[%s171_s1] sm:$0xff]  ;;  %101 = vset.pattern.permute.xlu0 %v133_v2  ;;  %v27_v4 = vld [vmem:[%s170_s0 + $0x8] sm:$0xff]  ;;  %102 = vset.pattern.permute.xlu1 %v133_v2 }
   0x2   :  { %v26_v1 = vld [vmem:[%s170_s0] sm:$0xff]  ;;  %17 = vperm.xlu0 %101, %v12_v0   ;;  %v39_v5 = vmul.f32 1.442695, %v27_v4  ;;  %v13_v6 = vld [vmem:[%s171_s1 + $0x8] sm:$0xff] }
   0x3   :  { %v37_v3 = vmul.f32 1.442695, %v26_v1 }
   0x5   :  { %103 = vpow2.f32 %v37_v3 }
   0x6   :  { %7 = vsyncpa [#allocation3], 0  ;;  %105 = vpow2.f32 %v39_v5  ;;  %20 = vperm.xlu0 %101, %v13_v6   ;;  %vm30_vm0 = vcmask 261120   ;;  %v14_v11 = vlaneseq  ;;  %v134_v14 = vmov 0.003125   ;;  %s135_s0 = smov [#allocation2]  }
   0x7   :  { %vm62_vm3 = vcmp.ne.s32.totalorder %v12_v0, 0  ;;  %vm63_vm4 = vcmp.ne.s32.totalorder %v13_v6, 0  ;;  %vm68_vm5 = vcmask 7168   ;;  %s90_s1 = sshll.u32 %s135_s0, 4  ;;  %s91_s1 = int_to_ptr.vmem [resolvable:$true] %s90_s1 }
   0x8   :  { %v15_v12 = vand.u32 127, %v14_v11  ;;  %s111_s17 = scalar_lea.vmem %s91_s1, 16  ;;  %s115_s18 = scalar_lea.vmem %s91_s1, 32 }
   0x9   :  { %p112_p0 = scmp.ne.s32.totalorder %s91_s1, %s111_s17  ;;  %p116_p1 = scmp.lt.s32.totalorder %s91_s1, %s91_s1 }
   0xa   :  { %p117_p2 = scmp.lt.s32.totalorder %s115_s18, %s111_s17 }
   0xc   :  { %p118_p3 = por %p117_p2, %p116_p1 }
   0xe   :  { %p119_p4 = pnand %p118_p3, %p112_p0 }
  0x12   :  { %v104_v7 = vpop.eup %103 }
  0x13   :  { %v106_v8 = vpop.eup %105  ;;  %v41_v9 = vsel %vm30_vm0, %v104_v7, 0.0 }
  0x14   :  { %42 = vadd.xlane.f32.xlu1 %v41_v9  ;;  %v44_v10 = vsel %vm30_vm0, %v106_v8, 0.0 }
  0x18   :  { %45 = vadd.xlane.f32.xlu1 %v44_v10 }
  0x7d   :  { %v18_v13 = vpop.permute.xlu0 %17 }
  0x7e   :  { %vm22_vm1 = vcmp.eq.s32.totalorder %v15_v12, %v18_v13 }
  0x7f   :  { %v24_v15 = vsel %vm22_vm1, 0.903125, %v134_v14 }
  0x80   :  { %v28_v16 = vmul.f32 %v26_v1, %v24_v15 }
  0x81   :  { %v21_v17 = vpop.permute.xlu0 %20 }
  0x82   :  { %vm23_vm2 = vcmp.eq.s32.totalorder %v15_v12, %v21_v17  ;;  %v31_v18 = vsel %vm30_vm0, %v28_v16, 0.0 }
  0x83   :  { %v25_v19 = vsel %vm23_vm2, 0.903125, %v134_v14  ;;  %32 = vadd.xlane.f32.xlu0 %v31_v18 }
  0x84   :  { %v29_v20 = vmul.f32 %v27_v4, %v25_v19 }
  0x86   :  { %v34_v21 = vsel %vm30_vm0, %v29_v20, 0.0 }
  0x87   :  { %35 = vadd.xlane.f32.xlu1 %v34_v21 }
  0x9d   :  { %v43_v22 = vpop.xlane.xlu1 %42 }
  0x9e   :  { %107 = vlog2.f32 %v43_v22 }
  0xa1   :  { %v46_v23 = vpop.xlane.xlu1 %45 }
  0xa2   :  { %109 = vlog2.f32 %v46_v23 }
  0xab   :  { %v108_v24 = vpop.eup %107 }
  0xac   :  { %v48_v25 = vmul.f32 0.6931472, %v108_v24 }
  0xaf   :  { %v110_v26 = vpop.eup %109 }
  0xb0   :  { %v50_v29 = vmul.f32 0.6931472, %v110_v26 }
 0x10c   :  { %v33_v27 = vpop.xlane.xlu0 %32 }
 0x10d   :  { %v51_v28 = vsub.f32 %v33_v27, %v48_v25 }
 0x10f   :  { %v66_v31 = vsel %vm62_vm3, %v51_v28, 0.0 }
 0x110   :  { %v36_v30 = vpop.xlane.xlu1 %35  ;;  %v69_v34 = vsel %vm68_vm5, %v66_v31, 0.0 }
 0x111   :  { %v52_v32 = vsub.f32 %v36_v30, %v50_v29 }
 0x113   :  { %v67_v33 = vsel %vm63_vm4, %v52_v32, 0.0 }
 0x114   :  { %v70_v35 = vsel %vm68_vm5, %v67_v33, 0.0 }
 0x115   :  { %v71_v36 = vadd.f32 %v70_v35, %v69_v34 }
 0x117   :  { %v72_v37 = vrot.slane %v71_v36, 4 }
 0x119   :  { %v73_v38 = vadd.f32 %v72_v37, %v71_v36 }
 0x11b   :  { %v74_v39 = vrot.slane %v73_v38, 2 }
 0x11d   :  { %v75_v40 = vadd.f32 %v74_v39, %v73_v38 }
 0x11f   :  { %v76_v41 = vrot.slane %v75_v40, 1 }
 0x121   :  { %v77_v42 = vadd.f32 %v76_v41, %v75_v40 }
 0x123   :  { %80 = vperm.xlu1 %102, %v77_v42  }
 0x19e   :  { %v81_v43 = vpop.permute.xlu1 %80 }
 0x19f   :  { %83 = vst [vmem:[#allocation2] sm:$0x1] %v81_v43 }
 0x1a0   :  { %122 = shalt.err (!%p119_p4)
}
 0x1a1   :  { %93 = dma.vmem_to_hbm [thread:$0]  %s91_s1, 16, %s172_s2, [#allocation3]  }
 0x1a2   :  { %131 = dma.done.wait [#allocation3], 16  }
 0x1a3   :  { %132 = vsyncadd [#allocation3], 4294967280 }
 0x1a4   :  { %97 = vsyncpa [#allocation3], 1 }

</bundles_post_ra>
